<compile_context>
chip_gen: v6e
topology: v6e:2x2x1
jax: 0.10.0
libtpu: 0.0.40
codegen_flags: <defaults>
</compile_context>

<pallas_src>
import jax
import jax.numpy as jnp
from jax.experimental import pallas as pl
from jax.experimental.pallas import tpu as pltpu


def _round_up(x, m):
    return (x + m - 1) // m * m


def sage_prelu_kernel(a_ref, xk_ref, xi_ref, w_ref, b_ref, alpha_ref,
                      o_ref, acc_ref):
    """One fused SAGEConv + PReLU layer (one (row-tile, k-tile) grid step).

    a_ref:     [TM, TK]       bf16 row-normalized adjacency tile
    xk_ref:    [TK, Cp]       bf16 neighbor feature rows (reduction tile)
    xi_ref:    [TM, Cp]       bf16 root feature rows (resident across k)
    w_ref:     [2*Cp, Coutp]  f32 stacked [W_l; W_r]
    b_ref:     [1, Coutp]     f32 lin_l bias (zero-padded)
    alpha_ref: [1, Coutp]     f32 PReLU per-channel slope (zero-padded)
    o_ref:     [TM, Coutp]    f32 output tile
    acc_ref:   [TM, 2*Cp]     f32 scratch: [:, :Cp] running A@X,
                              [:, Cp:] root features (staged at k == 0)
    """
    k = pl.program_id(1)
    cp = xk_ref.shape[1]

    @pl.when(k == 0)
    def _init():
        acc_ref[:, :cp] = jnp.zeros((acc_ref.shape[0], cp), jnp.float32)
        acc_ref[:, cp:] = xi_ref[...].astype(jnp.float32)

    acc_ref[:, :cp] += jnp.dot(a_ref[...], xk_ref[...],
                               preferred_element_type=jnp.float32)

    @pl.when(k == pl.num_programs(1) - 1)
    def _finalize():
        h = jnp.dot(acc_ref[...], w_ref[...],
                    preferred_element_type=jnp.float32) + b_ref[...]
        o_ref[...] = jnp.where(h > 0, h, alpha_ref[...] * h)


def sage_prelu_layer(a_bf16, x_bf16, w_cat, b, alpha, *, tm, tk):
    np_ = a_bf16.shape[0]
    cp = x_bf16.shape[1]
    coutp = w_cat.shape[1]
    grid = (np_ // tm, np_ // tk)
    return pl.pallas_call(
        sage_prelu_kernel,
        out_shape=jax.ShapeDtypeStruct((np_, coutp), jnp.float32),
        grid_spec=pltpu.PrefetchScalarGridSpec(
            num_scalar_prefetch=0,
            grid=grid,
            in_specs=[
                pl.BlockSpec((tm, tk), lambda i, k: (i, k)),         # A tile
                pl.BlockSpec((tk, cp), lambda i, k: (k, 0)),         # X (reduction)
                pl.BlockSpec((tm, cp), lambda i, k: (i, 0)),         # X (root rows)
                pl.BlockSpec((2 * cp, coutp), lambda i, k: (0, 0)),  # [W_l; W_r], resident
                pl.BlockSpec((1, coutp), lambda i, k: (0, 0)),       # bias, resident
                pl.BlockSpec((1, coutp), lambda i, k: (0, 0)),       # alpha, resident
            ],
            out_specs=pl.BlockSpec((tm, coutp), lambda i, k: (i, 0)),
            scratch_shapes=[pltpu.VMEM((tm, 2 * cp), jnp.float32)],
        ),
        compiler_params=pltpu.CompilerParams(
            dimension_semantics=("parallel", "arbitrary"),
            vmem_limit_bytes=48 * 1024 * 1024,
        ),
    )(a_bf16, x_bf16, x_bf16, w_cat, b, alpha)


def init_encoder_params(key, channels):
    """Mirrors SAGEConv (lin_l w/ bias, lin_r w/o bias) + PReLU(alpha=0.25)."""
    params = []
    for i in range(len(channels) - 1):
        cin, cout = channels[i], channels[i + 1]
        key, k1, k2, k3 = jax.random.split(key, 4)
        scale = 1.0 / float(cin) ** 0.5
        w_l = jax.random.uniform(k1, (cin, cout), jnp.float32, -scale, scale)
        w_r = jax.random.uniform(k2, (cin, cout), jnp.float32, -scale, scale)
        b = jax.random.uniform(k3, (cout,), jnp.float32, -scale, scale)
        alpha = jnp.full((cout,), 0.25, jnp.float32)
        params.append((w_l, w_r, b, alpha))
    return params


def _prepare_layer(w_l, w_r, b, alpha):
    """Pad to lane-dense (128-multiple) feature dims and stack [W_l; W_r]."""
    cin, cout = w_l.shape
    cinp = _round_up(cin, 128)
    coutp = _round_up(cout, 128)
    wl_p = jnp.zeros((cinp, coutp), jnp.float32).at[:cin, :cout].set(w_l)
    wr_p = jnp.zeros((cinp, coutp), jnp.float32).at[:cin, :cout].set(w_r)
    w_cat = jnp.concatenate([wl_p, wr_p], axis=0)      # [2*cinp, coutp]
    b_p = jnp.zeros((1, coutp), jnp.float32).at[0, :cout].set(b)
    alpha_p = jnp.zeros((1, coutp), jnp.float32).at[0, :cout].set(alpha)
    return w_cat, b_p, alpha_p, cinp, coutp


def encoder_forward(params, x, edge_index):
    """x: [N, C0] node features, edge_index: [2, E] (row 0 = src, row 1 = dst)."""
    x = x.astype(jnp.float32)                          # matches x.float()
    n = x.shape[0]
    src, dst = edge_index[0], edge_index[1]

    # Dense mean-aggregation operator: A[i, j] = (#edges j->i) / in_degree(i).
    adj = jnp.zeros((n, n), jnp.float32).at[dst, src].add(1.0)
    deg = adj.sum(axis=1, keepdims=True)
    a = adj / jnp.maximum(deg, 1.0)                    # zero rows for isolated nodes

    # Tile sizes / padded node count.
    if n <= 512:
        np_ = _round_up(n, 128)
        tm = tk = np_                                  # single aligned tile
    else:
        tm = tk = 512                                  # ~85% of HBM roofline
        np_ = _round_up(n, 512)

    a_p = jnp.zeros((np_, np_), jnp.float32).at[:n, :n].set(a)
    a_bf16 = a_p.astype(jnp.bfloat16)

    cin0 = x.shape[1]
    cinp0 = _round_up(cin0, 128)
    h = jnp.zeros((np_, cinp0), jnp.float32).at[:n, :cin0].set(x)

    for (w_l, w_r, b, alpha) in params:
        w_cat, b_p, alpha_p, cinp, _ = _prepare_layer(w_l, w_r, b, alpha)
        assert h.shape[1] == cinp
        h = sage_prelu_layer(a_bf16, h.astype(jnp.bfloat16),
                             w_cat, b_p, alpha_p, tm=tm, tk=tk)

    cout_last = params[-1][0].shape[1]
    return h[:n, :cout_last]


def encoder_reference(params, x, edge_index):
    """Pure-JAX f32 reference (dense mean aggregation), for tolerance check."""
    n = x.shape[0]
    src, dst = edge_index[0], edge_index[1]
    adj = jnp.zeros((n, n), jnp.float32).at[dst, src].add(1.0)
    deg = adj.sum(axis=1, keepdims=True)
    a = adj / jnp.maximum(deg, 1.0)
    x = x.astype(jnp.float32)
    for (w_l, w_r, b, alpha) in params:
        h = a @ x @ w_l + x @ w_r + b[None, :]
        x = jnp.where(h > 0, h, alpha[None, :] * h)
    return x


if __name__ == "__main__":
    key = jax.random.PRNGKey(0)
    k_x, k_edge, k_params = jax.random.split(key, 3)

    N = 8                        # number of graph nodes
    E = 24                       # number of edges
    channels = [4, 32, 16]       # Encoder(channels): 2 SAGEConv + PReLU layers

    x = jax.random.normal(k_x, (N, channels[0]), jnp.float32)
    edge_index = jax.random.randint(k_edge, (2, E), 0, N, jnp.int32)

    params = init_encoder_params(k_params, channels)

    out = encoder_forward(params, x, edge_index)
    out = jax.block_until_ready(out)
    assert out.shape == (N, channels[-1]), out.shape

    ref = encoder_reference(params, x, edge_index)
    err = float(jnp.max(jnp.abs(out - ref)))
    assert err < 1e-1, f"max abs error vs f32 reference: {err}"  # bf16 A/X streaming

    print("KERNEL_OK")
</pallas_src>

<mosaic_0001>
module attributes {stable_mosaic.version = 11 : i64} {
  func.func @sage_prelu_kernel(%arg0: i32, %arg1: i32, %arg2: memref<128x128xbf16, #tpu.memory_space<vmem>>, %arg3: memref<128x128xbf16, #tpu.memory_space<vmem>>, %arg4: memref<128x128xbf16, #tpu.memory_space<vmem>>, %arg5: memref<256x128xf32, #tpu.memory_space<vmem>>, %arg6: memref<1x128xf32, #tpu.memory_space<vmem>>, %arg7: memref<1x128xf32, #tpu.memory_space<vmem>>, %arg8: memref<128x128xf32, #tpu.memory_space<vmem>>, %arg9: memref<128x256xf32, #tpu.memory_space<vmem>>) attributes {dimension_semantics = [#tpu.dimension_semantics<parallel>, #tpu.dimension_semantics<arbitrary>], iteration_bounds = array<i64: 1, 1>, scalar_prefetch = 0 : i64, scratch_operands = 1 : i64, tpu.core_type = #tpu.core_type<tc>, window_params = [{transform_indices = @transform_0, window_bounds = array<i64: 128, 128>}, {transform_indices = @transform_1, window_bounds = array<i64: 128, 128>}, {transform_indices = @transform_2, window_bounds = array<i64: 128, 128>}, {pipeline_mode = #tpu.pipeline_mode<synchronous>, transform_indices = @transform_3, window_bounds = array<i64: 256, 128>}, {pipeline_mode = #tpu.pipeline_mode<synchronous>, transform_indices = @transform_4, window_bounds = array<i64: 1, 128>}, {pipeline_mode = #tpu.pipeline_mode<synchronous>, transform_indices = @transform_5, window_bounds = array<i64: 1, 128>}, {transform_indices = @transform_6, window_bounds = array<i64: 128, 128>}]} {
    %c0_i32 = arith.constant 0 : i32
    %0 = arith.cmpi eq, %arg1, %c0_i32 : i32
    %1 = arith.extui %0 : i1 to i32
    %c0_i32_0 = arith.constant 0 : i32
    %2 = arith.cmpi ne, %1, %c0_i32_0 : i32
    scf.if %2 {
      %cst_10 = arith.constant 0.000000e+00 : f32
      %12 = vector.broadcast %cst_10 : f32 to vector<128x128xf32>
      %c0_11 = arith.constant 0 : index
      %c0_12 = arith.constant 0 : index
      %13 = vector.load %arg9[%c0_11, %c0_12] : memref<128x256xf32, #tpu.memory_space<vmem>>, vector<128x128xf32>
      tpu.vector_store %arg9[%c0_11, %c0_12], %12 {strides = array<i32>} : memref<128x256xf32, #tpu.memory_space<vmem>>, vector<128x128xf32>,
      %c0_13 = arith.constant 0 : index
      %c0_14 = arith.constant 0 : index
      %14 = vector.load %arg4[%c0_13, %c0_14] : memref<128x128xbf16, #tpu.memory_space<vmem>>, vector<128x128xbf16>
      %15 = arith.extf %14 : vector<128x128xbf16> to vector<128x128xf32>
      %c0_15 = arith.constant 0 : index
      %c128 = arith.constant 128 : index
      %16 = vector.load %arg9[%c0_15, %c128] : memref<128x256xf32, #tpu.memory_space<vmem>>, vector<128x128xf32>
      tpu.vector_store %arg9[%c0_15, %c128], %15 {strides = array<i32>} : memref<128x256xf32, #tpu.memory_space<vmem>>, vector<128x128xf32>,
    } else {
    }
    %c0 = arith.constant 0 : index
    %c0_1 = arith.constant 0 : index
    %3 = vector.load %arg9[%c0, %c0_1] : memref<128x256xf32, #tpu.memory_space<vmem>>, vector<128x128xf32>
    %c0_2 = arith.constant 0 : index
    %c0_3 = arith.constant 0 : index
    %4 = vector.load %arg2[%c0_2, %c0_3] : memref<128x128xbf16, #tpu.memory_space<vmem>>, vector<128x128xbf16>
    %c0_4 = arith.constant 0 : index
    %c0_5 = arith.constant 0 : index
    %5 = vector.load %arg3[%c0_4, %c0_5] : memref<128x128xbf16, #tpu.memory_space<vmem>>, vector<128x128xbf16>
    %cst = arith.constant dense<0.000000e+00> : vector<128x128xf32>
    %6 = tpu.matmul %4, %5, %cst {dimension_numbers = #tpu.dot_dimension_numbers<[1], [0], [0], [1], [0, 0, 1, 1], [], []>} : vector<128x128xbf16>, vector<128x128xbf16>, vector<128x128xf32> -> vector<128x128xf32>
    %7 = arith.addf %3, %6 : vector<128x128xf32>
    %c0_6 = arith.constant 0 : index
    %c0_7 = arith.constant 0 : index
    %8 = vector.load %arg9[%c0_6, %c0_7] : memref<128x256xf32, #tpu.memory_space<vmem>>, vector<128x128xf32>
    tpu.vector_store %arg9[%c0_6, %c0_7], %7 {strides = array<i32>} : memref<128x256xf32, #tpu.memory_space<vmem>>, vector<128x128xf32>,
    %c0_i32_8 = arith.constant 0 : i32
    %9 = arith.cmpi eq, %arg1, %c0_i32_8 : i32
    %10 = arith.extui %9 : i1 to i32
    %c0_i32_9 = arith.constant 0 : i32
    %11 = arith.cmpi ne, %10, %c0_i32_9 : i32
    scf.if %11 {
      %c0_10 = arith.constant 0 : index
      %c0_11 = arith.constant 0 : index
      %12 = vector.load %arg9[%c0_10, %c0_11] : memref<128x256xf32, #tpu.memory_space<vmem>>, vector<128x256xf32>
      %c0_12 = arith.constant 0 : index
      %c0_13 = arith.constant 0 : index
      %13 = vector.load %arg5[%c0_12, %c0_13] : memref<256x128xf32, #tpu.memory_space<vmem>>, vector<256x128xf32>
      %cst_14 = arith.constant dense<0.000000e+00> : vector<128x128xf32>
      %14 = tpu.matmul %12, %13, %cst_14 {dimension_numbers = #tpu.dot_dimension_numbers<[1], [0], [0], [1], [0, 0, 1, 1], [], []>} : vector<128x256xf32>, vector<256x128xf32>, vector<128x128xf32> -> vector<128x128xf32>
      %c0_15 = arith.constant 0 : index
      %c0_16 = arith.constant 0 : index
      %15 = vector.load %arg6[%c0_15, %c0_16] : memref<1x128xf32, #tpu.memory_space<vmem>>, vector<1x128xf32>
      %16 = vector.broadcast %15 : vector<1x128xf32> to vector<128x128xf32>
      %17 = arith.addf %14, %16 : vector<128x128xf32>
      %cst_17 = arith.constant 0.000000e+00 : f32
      %18 = vector.broadcast %cst_17 : f32 to vector<128x128xf32>
      %19 = arith.cmpf ogt, %17, %18 : vector<128x128xf32>
      %c0_18 = arith.constant 0 : index
      %c0_19 = arith.constant 0 : index
      %20 = vector.load %arg7[%c0_18, %c0_19] : memref<1x128xf32, #tpu.memory_space<vmem>>, vector<1x128xf32>
      %21 = vector.broadcast %20 : vector<1x128xf32> to vector<128x128xf32>
      %22 = arith.mulf %21, %17 : vector<128x128xf32>
      %23 = arith.select %19, %17, %22 : vector<128x128xi1>, vector<128x128xf32>
      %c0_20 = arith.constant 0 : index
      %c0_21 = arith.constant 0 : index
      %24 = vector.load %arg8[%c0_20, %c0_21] : memref<128x128xf32, #tpu.memory_space<vmem>>, vector<128x128xf32>
      tpu.vector_store %arg8[%c0_20, %c0_21], %23 {strides = array<i32>} : memref<128x128xf32, #tpu.memory_space<vmem>>, vector<128x128xf32>,
    } else {
    }
    return
  }
  func.func @transform_0(%arg0: i32, %arg1: i32) -> (i32, i32) {
    %c0_i32 = arith.constant 0 : i32
    return %arg0, %arg1 : i32, i32
  }
  func.func @transform_1(%arg0: i32, %arg1: i32) -> (i32, i32) {
    %c0_i32 = arith.constant 0 : i32
    %c0_i32_0 = arith.constant 0 : i32
    return %arg1, %c0_i32 : i32, i32
  }
  func.func @transform_2(%arg0: i32, %arg1: i32) -> (i32, i32) {
    %c0_i32 = arith.constant 0 : i32
    %c0_i32_0 = arith.constant 0 : i32
    return %arg0, %c0_i32 : i32, i32
  }
  func.func @transform_3(%arg0: i32, %arg1: i32) -> (i32, i32) {
    %c0_i32 = arith.constant 0 : i32
    %c0_i32_0 = arith.constant 0 : i32
    %c0_i32_1 = arith.constant 0 : i32
    return %c0_i32, %c0_i32_0 : i32, i32
  }
  func.func @transform_4(%arg0: i32, %arg1: i32) -> (i32, i32) {
    %c0_i32 = arith.constant 0 : i32
    %c0_i32_0 = arith.constant 0 : i32
    %c0_i32_1 = arith.constant 0 : i32
    return %c0_i32, %c0_i32_0 : i32, i32
  }
  func.func @transform_5(%arg0: i32, %arg1: i32) -> (i32, i32) {
    %c0_i32 = arith.constant 0 : i32
    %c0_i32_0 = arith.constant 0 : i32
    %c0_i32_1 = arith.constant 0 : i32
    return %c0_i32, %c0_i32_0 : i32, i32
  }
  func.func @transform_6(%arg0: i32, %arg1: i32) -> (i32, i32) {
    %c0_i32 = arith.constant 0 : i32
    %c0_i32_0 = arith.constant 0 : i32
    return %arg0, %c0_i32 : i32, i32
  }
}

</mosaic_0001>

<bundles_post_ra>
// kernel: tpu_custom_call.1
= control target key start
LH: loop header
LB: loop body
LE: loop exit
PB: predicated region body
PF: predicated region fallthrough
CT: control target
= control target key end

     0   :  { %11 = vsyncpa [#allocation4], 0  ;;  %s1187_s0 = inlined_call_operand.hbm [shape: bf16[128,128], index: 0, kind: input, shape index: {}]   ;;  %s1188_s1 = inlined_call_operand.hbm [shape: bf16[128,128], index: 1, kind: input, shape index: {}]   ;;  %s1189_s2 = inlined_call_operand.hbm [shape: bf16[128,128], index: 2, kind: input, shape index: {}]   ;;  %s1190_s3 = inlined_call_operand.hbm [shape: f32[256,128], index: 3, kind: input, shape index: {}]   ;;  %s1191_s4 = inlined_call_operand.vmem [shape: f32[1,128], index: 4, kind: input, shape index: {}]   ;;  %s1192_s5 = inlined_call_operand.vmem [shape: f32[1,128], index: 5, kind: input, shape index: {}]   ;;  %s1193_s6 = inlined_call_operand.hbm [shape: f32[128,128], index: 6, kind: output, shape index: {}]  }
   0x1   :  { %12 = vsyncpa [#allocation7], 0 }
   0x2   :  { %13 = vsyncpa [#allocation10], 0 }
   0x3   :  { %14 = vsyncpa [#allocation5], 0  ;;  %s1080_s21 = smov [#allocation6]   ;;  %s1081_s23 = smov [#allocation3]  }
   0x4   :  { %s32_s22 = sshll.u32 %s1080_s21, 4  ;;  %s20_s24 = sshll.u32 %s1081_s23, 4  ;;  %s33_s22 = int_to_ptr.vmem [resolvable:$true] %s32_s22  ;;  %s21_s24 = int_to_ptr.vmem [resolvable:$true] %s20_s24 }
   0x5   :  { %s980_s25 = scalar_lea.vmem %s33_s22, 1024  ;;  %p985_p1 = scmp.lt.s32.totalorder %s33_s22, %s33_s22 }
   0x6   :  { %p981_p0 = scmp.ne.s32.totalorder %s33_s22, %s980_s25  ;;  %p986_p2 = scmp.lt.s32.totalorder %s980_s25, %s980_s25 }
   0x8   :  { %p987_p3 = por %p986_p2, %p985_p1 }
   0xa   :  { %p988_p4 = pnand %p987_p3, %p981_p0 }
   0xc   :  { %991 = shalt.err (!%p988_p4)
}
   0xd   :  { %s1082_s26 = smov 64   ;;  %s1083_s27 = smov 4  }
   0xe   :  { %38 = dma.hbm_to_vmem [thread:$0]  %s1188_s1, 1024, %s33_s22, [#allocation7], %s1082_s26, %s1082_s26, %s1083_s27  }
   0xf   :  { %s1000_s30 = scalar_lea.vmem %s21_s24, 1024  ;;  %p1005_p6 = scmp.lt.s32.totalorder %s21_s24, %s21_s24 }
  0x10   :  { %p1001_p5 = scmp.ne.s32.totalorder %s21_s24, %s1000_s30  ;;  %p1006_p7 = scmp.lt.s32.totalorder %s1000_s30, %s1000_s30 }
  0x12   :  { %p1007_p8 = por %p1006_p7, %p1005_p6 }
  0x14   :  { %p1008_p9 = pnand %p1007_p8, %p1001_p5 }
  0x16   :  { %1011 = shalt.err (!%p1008_p9)
}
  0x17   :  { %26 = dma.hbm_to_vmem [thread:$0]  %s1187_s0, 1024, %s21_s24, [#allocation4], %s1082_s26, %s1082_s26, %s1083_s27  }
  0x18   :  { %s1084_s9 = smov [#allocation8]   ;;  %s1085_s11 = smov [#allocation9]  }
  0x19   :  { %s44_s10 = sshll.u32 %s1084_s9, 4  ;;  %s56_s12 = sshll.u32 %s1085_s11, 4  ;;  %s45_s10 = int_to_ptr.vmem [resolvable:$true] %s44_s10  ;;  %s57_s12 = int_to_ptr.vmem [resolvable:$true] %s56_s12 }
  0x1a   :  { %s1020_s13 = scalar_lea.vmem %s45_s10, 1024  ;;  %p1025_p11 = scmp.lt.s32.totalorder %s45_s10, %s45_s10 }
  0x1b   :  { %p1021_p10 = scmp.ne.s32.totalorder %s45_s10, %s1020_s13  ;;  %p1026_p12 = scmp.lt.s32.totalorder %s1020_s13, %s1020_s13 }
  0x1d   :  { %p1027_p13 = por %p1026_p12, %p1025_p11 }
  0x1f   :  { %p1028_p0 = pnand %p1027_p13, %p1021_p10 }
  0x21   :  { %1031 = shalt.err (!%p1028_p0)
}
  0x22   :  { %50 = dma.hbm_to_vmem [thread:$0]  %s1189_s2, 1024, %s45_s10, [#allocation7], %s1082_s26, %s1082_s26, %s1083_s27  }
  0x23   :  { %s1040_s15 = scalar_lea.vmem %s57_s12, 4096  ;;  %p1045_p2 = scmp.lt.s32.totalorder %s57_s12, %s57_s12 }
  0x24   :  { %p1041_p1 = scmp.ne.s32.totalorder %s57_s12, %s1040_s15  ;;  %p1046_p3 = scmp.lt.s32.totalorder %s1040_s15, %s1040_s15 }
  0x26   :  { %p1047_p4 = por %p1046_p3, %p1045_p2 }
  0x28   :  { %p1048_p5 = pnand %p1047_p4, %p1041_p1 }
  0x2a   :  { %1051 = shalt.err (!%p1048_p5)
}
  0x2b   :  { %s1086_s0 = smov 128   ;;  %s1087_s16 = smov 8  }
  0x2c   :  { %62 = dma.hbm_to_vmem [thread:$0]  %s1190_s3, 4096, %s57_s12, [#allocation10], %s1086_s0, %s1086_s0, %s1087_s16  }
  0x2d   :  { %1072 = dma.done.wait [#allocation4], 1024  }
  0x2e   :  { %1073 = vsyncadd [#allocation4], 4294966272 }
  0x2f   :  { %1074 = dma.done.wait [#allocation7], 2048  }
  0x30   :  { %1075 = vsyncadd [#allocation7], 4294965248 }
  0x31   :  { %1076 = dma.done.wait [#allocation10], 4096  }
  0x32   :  { %1077 = vsyncadd [#allocation10], 4294963200  ;;  %v956_v0 = vld [vmem:[#allocation6 + $0x38] sm:$0xff]   ;;  %v957_v1 = vld [vmem:[#allocation6 + $0x30] sm:$0xff]  }
  0x33   :  { %883 = vmatprep.subr.bf16.mxu0 %v956_v0  ;;  %v958_v2 = vld [vmem:[#allocation6 + $0x28] sm:$0xff]   ;;  %v959_v3 = vld [vmem:[#allocation6 + $0x20] sm:$0xff]   ;;  %v960_v5 = vld [vmem:[#allocation6 + $0x18] sm:$0xff]  }
  0x34   :  { %884 = vmatpush3.bf16.msra.mxu0 %v956_v0  ;;  %v964_v4 = vld [vmem:[#allocation3] sm:$0xff]   ;;  %v961_v6 = vld [vmem:[#allocation6 + $0x10] sm:$0xff]   ;;  %v487_v7 = vld [vmem:[#allocation9 + $0xf8] sm:$0xff] }
  0x35   :  { %885 = vmatprep.subr.bf16.mxu0 %v957_v1  ;;  %899 = vmatprep.mubr.bf16.mxu0 %v964_v4  ;;  %v471_v8 = vld [vmem:[#allocation9 + $0x78] sm:$0xff]  ;;  %v486_v9 = vld [vmem:[#allocation9 + $0xf0] sm:$0xff]  ;;  %v962_v11 = vld [vmem:[#allocation6 + $0x8] sm:$0xff]  }
  0x36   :  { %915 = vmatprep.subr.mxu1 %v487_v7  ;;  %v470_v10 = vld [vmem:[#allocation9 + $0x70] sm:$0xff]  ;;  %v485_v12 = vld [vmem:[#allocation9 + $0xe8] sm:$0xff]  ;;  %v484_v14 = vld [vmem:[#allocation9 + $0xe0] sm:$0xff] }
  0x37   :  { %931 = vmatpush3.msra.mxu1 %v471_v8  ;;  %v469_v13 = vld [vmem:[#allocation9 + $0x68] sm:$0xff]  ;;  %v468_v15 = vld [vmem:[#allocation9 + $0x60] sm:$0xff]  ;;  %v483_v17 = vld [vmem:[#allocation9 + $0xd8] sm:$0xff] }
  0x38   :  { %886 = vmatpush3.bf16.msra.mxu0 %v957_v1  ;;  %916 = vmatprep.subr.mxu1 %v486_v9  ;;  %v963_v16 = vld [vmem:[#allocation6] sm:$0xff]   ;;  %v467_v18 = vld [vmem:[#allocation9 + $0x58] sm:$0xff]  ;;  %v482_v19 = vld [vmem:[#allocation9 + $0xd0] sm:$0xff] }
  0x39   :  { %887 = vmatprep.subr.bf16.mxu0 %v958_v2  ;;  %932 = vmatpush3.msra.mxu1 %v470_v10  ;;  %v466_v20 = vld [vmem:[#allocation9 + $0x50] sm:$0xff]  ;;  %v481_v21 = vld [vmem:[#allocation9 + $0xc8] sm:$0xff]  ;;  %v480_v24 = vld [vmem:[#allocation9 + $0xc0] sm:$0xff] }
  0x3a   :  { %917 = vmatprep.subr.mxu1 %v485_v12  ;;  %v465_v22 = vld [vmem:[#allocation9 + $0x48] sm:$0xff]  ;;  %v966_v25 = vld [vmem:[#allocation3 + $0x10] sm:$0xff]   ;;  %v464_v26 = vld [vmem:[#allocation9 + $0x40] sm:$0xff] }
  0x3b   :  { %933 = vmatpush3.msra.mxu1 %v469_v13  ;;  %v965_v23 = vld [vmem:[#allocation3 + $0x8] sm:$0xff]   ;;  %v479_v27 = vld [vmem:[#allocation9 + $0xb8] sm:$0xff]  ;;  %v478_v29 = vld [vmem:[#allocation9 + $0xb0] sm:$0xff] }
  0x3c   :  { %888 = vmatpush3.bf16.msra.mxu0 %v958_v2  ;;  %918 = vmatprep.subr.mxu1 %v484_v14  ;;  %v463_v28 = vld [vmem:[#allocation9 + $0x38] sm:$0xff]  ;;  %v462_v30 = vld [vmem:[#allocation9 + $0x30] sm:$0xff]  ;;  %v477_v31 = vld [vmem:[#allocation9 + $0xa8] sm:$0xff] }
  0x3d   :  { %889 = vmatprep.subr.bf16.mxu0 %v959_v3  ;;  %934 = vmatpush3.msra.mxu1 %v468_v15  ;;  %v967_v32 = vld [vmem:[#allocation3 + $0x18] sm:$0xff]   ;;  %v461_v33 = vld [vmem:[#allocation9 + $0x28] sm:$0xff]  ;;  %v968_v34 = vld [vmem:[#allocation3 + $0x20] sm:$0xff]  }
  0x3e   :  { %919 = vmatprep.subr.mxu1 %v483_v17  ;;  %v476_v35 = vld [vmem:[#allocation9 + $0xa0] sm:$0xff]  ;;  %v475_v37 = vld [vmem:[#allocation9 + $0x98] sm:$0xff]  ;;  %v474_v39 = vld [vmem:[#allocation9 + $0x90] sm:$0xff] }
  0x3f   :  { %935 = vmatpush3.msra.mxu1 %v467_v18  ;;  %v460_v36 = vld [vmem:[#allocation9 + $0x20] sm:$0xff]  ;;  %v459_v38 = vld [vmem:[#allocation9 + $0x18] sm:$0xff]  ;;  %v969_v40 = vld [vmem:[#allocation3 + $0x28] sm:$0xff]  }
  0x40   :  { %890 = vmatpush3.bf16.msra.mxu0 %v959_v3  ;;  %920 = vmatprep.subr.mxu1 %v482_v19  ;;  %v458_v41 = vld [vmem:[#allocation9 + $0x10] sm:$0xff]  ;;  %v473_v43 = vld [vmem:[#allocation9 + $0x88] sm:$0xff]  ;;  %v971_v44 = vld [vmem:[#allocation3 + $0x38] sm:$0xff]  }
  0x41   :  { %891 = vmatprep.subr.bf16.mxu0 %v960_v5  ;;  %936 = vmatpush3.msra.mxu1 %v466_v20  ;;  %v970_v42 = vld [vmem:[#allocation3 + $0x30] sm:$0xff]   ;;  %v457_v45 = vld [vmem:[#allocation9 + $0x8] sm:$0xff]  ;;  %v749_v46 = vld [vmem:[#allocation8] sm:$0xff]  }
  0x42   :  { %921 = vmatprep.subr.mxu1 %v481_v21  ;;  %v472_v47 = vld [vmem:[#allocation9 + $0x80] sm:$0xff]  ;;  %v750_v48 = vunpack.c.l.bf16 %v749_v46  ;;  %v781_v50 = vld [vmem:[#allocation8 + $0x10] sm:$0xff]   ;;  %v751_v53 = vunpack.c.h.bf16 %v749_v46  ;;  %v780_v54 = vld [vmem:[#allocation8 + $0x8] sm:$0xff]  }
  0x43   :  { %937 = vmatpush3.msra.mxu1 %v465_v22  ;;  %v456_v49 = vld [vmem:[#allocation9] sm:$0xff]  ;;  %v758_v51 = vunpack.c.l.bf16 %v781_v50  ;;  %v754_v57 = vunpack.c.l.bf16 %v780_v54  ;;  %v759_v60 = vunpack.c.h.bf16 %v781_v50  ;;  %v755_v61 = vunpack.c.h.bf16 %v780_v54  ;;  %v782_v62 = vld [vmem:[#allocation8 + $0x18] sm:$0xff]  }
  0x44   :  { %892 = vmatpush3.bf16.msra.mxu0 %v960_v5  ;;  %922 = vmatprep.subr.mxu1 %v480_v24  ;;  %v762_v1 = vunpack.c.l.bf16 %v782_v62  ;;  %v763_v3 = vunpack.c.h.bf16 %v782_v62  ;;  %v783_v4 = vld [vmem:[#allocation8 + $0x20] sm:$0xff]  }
  0x45   :  { %893 = vmatprep.subr.bf16.mxu0 %v961_v6  ;;  %938 = vmatpush3.msra.mxu1 %v464_v26 }
  0x46   :  { %923 = vmatprep.subr.mxu1 %v479_v27  ;;  %579 = vmatprep.mubr.f32.mxu1 %v758_v51 }
  0x47   :  { %939 = vmatpush3.msra.mxu1 %v463_v28 }
  0x48   :  { %894 = vmatpush3.bf16.msra.mxu0 %v961_v6  ;;  %924 = vmatprep.subr.mxu1 %v478_v29  ;;  %v766_v6 = vunpack.c.l.bf16 %v783_v4 }
  0x49   :  { %895 = vmatprep.subr.bf16.mxu0 %v962_v11  ;;  %940 = vmatpush3.msra.mxu1 %v462_v30 }
  0x4a   :  { %925 = vmatprep.subr.mxu1 %v477_v31 }
  0x4b   :  { %941 = vmatpush3.msra.mxu1 %v461_v33 }
  0x4c   :  { %896 = vmatpush3.bf16.msra.mxu0 %v962_v11  ;;  %926 = vmatprep.subr.mxu1 %v476_v35 }
  0x4d   :  { %897 = vmatprep.subr.bf16.mxu0 %v963_v16  ;;  %942 = vmatpush3.msra.mxu1 %v460_v36 }
  0x4e   :  { %927 = vmatprep.subr.mxu1 %v475_v37 }
  0x4f   :  { %943 = vmatpush3.msra.mxu1 %v459_v38 }
  0x50   :  { %898 = vmatpush3.bf16.msra.mxu0 %v963_v16  ;;  %928 = vmatprep.subr.mxu1 %v474_v39 }
  0x51   :  { %803 = vmatprep.subr.mxu0 %v487_v7  ;;  %944 = vmatpush3.msra.mxu1 %v458_v41 }
  0x52   :  { %929 = vmatprep.subr.mxu1 %v473_v43 }
  0x53   :  { %900 = vmatmul.mubr.bf16.vlgmr.msra.gmra.mxu0 %v965_v23  ;;  %945 = vmatpush3.msra.mxu1 %v457_v45 }
  0x54   :  { %903 = vmatprep.mubr.bf16.mxu0 %v966_v25  ;;  %804 = vmatpush3.msra.mxu0 %v471_v8  ;;  %v767_v8 = vunpack.c.h.bf16 %v783_v4  ;;  %v1142_v25 = vld [vmem:[%s1191_s4] ss:$0 sm:$0xff]  ;;  %s1088_s4 = smov [#allocation11]  }
  0x55   :  { %805 = vmatprep.subr.mxu0 %v486_v9  ;;  %930 = vmatprep.subr.mxu1 %v472_v47  ;;  %v784_v9 = vld [vmem:[#allocation8 + $0x28] sm:$0xff]  }
  0x56   :  { %806 = vmatpush3.msra.mxu0 %v470_v10  ;;  %946 = vmatpush3.msra.mxu1 %v456_v49  ;;  %v770_v11 = vunpack.c.l.bf16 %v784_v9 }
  0x57   :  { %807 = vmatprep.subr.mxu0 %v485_v12 }
  0x58   :  { %808 = vmatpush3.msra.mxu0 %v469_v13  ;;  %v771_v13 = vunpack.c.h.bf16 %v784_v9 }
  0x59   :  { %809 = vmatprep.subr.mxu0 %v484_v14  ;;  %v785_v14 = vld [vmem:[#allocation8 + $0x30] sm:$0xff]  }
  0x5a   :  { %810 = vmatpush3.msra.mxu0 %v468_v15  ;;  %v774_v16 = vunpack.c.l.bf16 %v785_v14 }
  0x5b   :  { %904 = vmatmul.mubr.bf16.gmra.mxu0 %v967_v32  ;;  %811 = vmatprep.subr.mxu0 %v483_v17 }
  0x5c   :  { %907 = vmatprep.mubr.bf16.mxu0 %v968_v34  ;;  %812 = vmatpush3.msra.mxu0 %v467_v18  ;;  %v775_v18 = vunpack.c.h.bf16 %v785_v14 }
  0x5d   :  { %813 = vmatprep.subr.mxu0 %v482_v19  ;;  %v786_v19 = vld [vmem:[#allocation8 + $0x38] sm:$0xff]  }
  0x5e   :  { %814 = vmatpush3.msra.mxu0 %v466_v20  ;;  %v779_v23 = vunpack.c.h.bf16 %v786_v19 }
  0x5f   :  { %815 = vmatprep.subr.mxu0 %v481_v21  ;;  %v778_v21 = vunpack.c.l.bf16 %v786_v19 }
  0x60   :  { %816 = vmatpush3.msra.mxu0 %v465_v22 }
  0x61   :  { %817 = vmatprep.subr.mxu0 %v480_v24 }
  0x62   :  { %818 = vmatpush3.msra.mxu0 %v464_v26 }
  0x63   :  { %908 = vmatmul.mubr.bf16.gmra.mxu0 %v969_v40  ;;  %819 = vmatprep.subr.mxu0 %v479_v27 }
  0x64   :  { %911 = vmatprep.mubr.bf16.mxu0 %v970_v42  ;;  %820 = vmatpush3.msra.mxu0 %v463_v28  ;;  %v1147_v28 = vld [vmem:[%s1192_s5] ss:$0 sm:$0xff]  ;;  %s716_s5 = sshll.u32 %s1088_s4, 4  ;;  %s717_s5 = int_to_ptr.vmem [resolvable:$true] %s716_s5 }
  0x65   :  { %821 = vmatprep.subr.mxu0 %v478_v29  ;;  %s1052_s21 = scalar_lea.vmem %s717_s5, 2048  ;;  %p1057_p7 = scmp.lt.s32.totalorder %s717_s5, %s717_s5 }
  0x66   :  { %822 = vmatpush3.msra.mxu0 %v462_v30  ;;  %p1053_p6 = scmp.ne.s32.totalorder %s717_s5, %s1052_s21  ;;  %p1058_p8 = scmp.lt.s32.totalorder %s1052_s21, %s1052_s21 }
  0x67   :  { %823 = vmatprep.subr.mxu0 %v477_v31 }
  0x68   :  { %824 = vmatpush3.msra.mxu0 %v461_v33  ;;  %p1059_p9 = por %p1058_p8, %p1057_p7 }
  0x69   :  { %825 = vmatprep.subr.mxu0 %v476_v35 }
  0x6a   :  { %826 = vmatpush3.msra.mxu0 %v460_v36  ;;  %p1060_p10 = pnand %p1059_p9, %p1053_p6 }
  0x6b   :  { %912 = vmatmul.mubr.bf16.gmra.mxu0 %v971_v44  ;;  %827 = vmatprep.subr.mxu0 %v475_v37 }
  0x6c   :  { %828 = vmatpush3.msra.mxu0 %v459_v38  ;;  %559 = vmatprep.mubr.f32.mxu0 %v750_v48 }
  0x6d   :  { %829 = vmatprep.subr.mxu0 %v474_v39 }
  0x6e   :  { %830 = vmatpush3.msra.mxu0 %v458_v41 }
  0x6f   :  { %831 = vmatprep.subr.mxu0 %v473_v43 }
  0x70   :  { %832 = vmatpush3.msra.mxu0 %v457_v45 }
  0x71   :  { %833 = vmatprep.subr.mxu0 %v472_v47 }
  0x72   :  { %834 = vmatpush3.msra.mxu0 %v456_v49 }
 0x113   :  { %v901_v52 = vpop.f32.mrf.mxu0 }
 0x115   :  { %v326_v55 = vpop.f32.mrf.mxu0 }
 0x116   :  { %560 = vmatmul.mubr.f32.vlgmr.msra.gmra.mxu0 %v326_v55 }
 0x117   :  { %v902_v56 = vpop.f32.mrf.mxu0  ;;  %564 = vmatprep.mubr.f32.mxu0 %v751_v53 }
 0x119   :  { %v329_v58 = vpop.f32.mrf.mxu0 }
 0x11a   :  { %565 = vmatmul.mubr.f32.gmra.mxu0 %v329_v58 }
 0x11b   :  { %v905_v59 = vpop.f32.mrf.mxu0  ;;  %569 = vmatprep.mubr.f32.mxu0 %v754_v57 }
 0x11d   :  { %v342_v63 = vpop.f32.mrf.mxu0 }
 0x11e   :  { %570 = vmatmul.mubr.f32.gmra.mxu0 %v901_v52  ;;  %580 = vmatmul.mubr.f32.vlgmr.msra.gmra.mxu1 %v342_v63 }
 0x11f   :  { %v906_v0 = vpop.f32.mrf.mxu0  ;;  %574 = vmatprep.mubr.f32.mxu0 %v755_v61  ;;  %584 = vmatprep.mubr.f32.mxu1 %v759_v60 }
 0x121   :  { %v345_v2 = vpop.f32.mrf.mxu0 }
 0x122   :  { %575 = vmatmul.mubr.f32.gmra.mxu0 %v902_v56  ;;  %585 = vmatmul.mubr.f32.gmra.mxu1 %v345_v2 }
 0x123   :  { %589 = vmatprep.mubr.f32.mxu1 %v762_v1  ;;  %v909_v5 = vpop.f32.mrf.mxu0 }
 0x125   :  { %v358_v7 = vpop.f32.mrf.mxu0 }
 0x126   :  { %590 = vmatmul.mubr.f32.gmra.mxu1 %v905_v59 }
 0x127   :  { %594 = vmatprep.mubr.f32.mxu1 %v763_v3  ;;  %v910_v10 = vpop.f32.mrf.mxu0 }
 0x129   :  { %v361_v12 = vpop.f32.mrf.mxu0 }
 0x12a   :  { %595 = vmatmul.mubr.f32.gmra.mxu1 %v906_v0 }
 0x12b   :  { %599 = vmatprep.mubr.f32.mxu1 %v766_v6  ;;  %v913_v15 = vpop.f32.mrf.mxu0 }
 0x12d   :  { %v374_v17 = vpop.f32.mrf.mxu0 }
 0x12e   :  { %600 = vmatmul.mubr.f32.gmra.mxu1 %v358_v7 }
 0x12f   :  { %604 = vmatprep.mubr.f32.mxu1 %v767_v8  ;;  %v914_v20 = vpop.f32.mrf.mxu0 }
 0x131   :  { %v377_v22 = vpop.f32.mrf.mxu0 }
 0x132   :  { %605 = vmatmul.mubr.f32.gmra.mxu1 %v361_v12 }
 0x133   :  { %609 = vmatprep.mubr.f32.mxu1 %v770_v11 }
 0x136   :  { %610 = vmatmul.mubr.f32.gmra.mxu1 %v909_v5 }
 0x137   :  { %614 = vmatprep.mubr.f32.mxu1 %v771_v13 }
 0x13a   :  { %615 = vmatmul.mubr.f32.gmra.mxu1 %v910_v10 }
 0x13b   :  { %619 = vmatprep.mubr.f32.mxu1 %v774_v16 }
 0x13e   :  { %620 = vmatmul.mubr.f32.gmra.mxu1 %v374_v17 }
 0x13f   :  { %624 = vmatprep.mubr.f32.mxu1 %v775_v18 }
 0x142   :  { %625 = vmatmul.mubr.f32.gmra.mxu1 %v377_v22 }
 0x143   :  { %629 = vmatprep.mubr.f32.mxu1 %v778_v21 }
 0x146   :  { %630 = vmatmul.mubr.f32.gmra.mxu1 %v913_v15 }
 0x147   :  { %634 = vmatprep.mubr.f32.mxu1 %v779_v23 }
 0x14a   :  { %635 = vmatmul.mubr.f32.gmra.mxu1 %v914_v20 }
 0x1d6   :  { %v835_v24 = vpop.f32.mrf.mxu0 }
 0x1d8   :  { %v836_v26 = vpop.f32.mrf.mxu0 }
 0x1d9   :  { %v837_v27 = vadd.f32 %v836_v26, %v835_v24 }
 0x1da   :  { %v838_v29 = vpop.f32.mrf.mxu0 }
 0x1db   :  { %v562_v30 = vadd.f32 %v837_v27, %v1142_v25 }
 0x1dc   :  { %v839_v31 = vpop.f32.mrf.mxu0 }
 0x1dd   :  { %vm640_vm0 = vcmp.gt.f32.partialorder %v562_v30, 0.0  ;;  %v663_v32 = vmul.f32 %v1147_v28, %v562_v30  ;;  %v840_v33 = vadd.f32 %v839_v31, %v838_v29 }
 0x1de   :  { %v841_v34 = vpop.f32.mrf.mxu0  ;;  %v847_v35 = vpop.f32.mrf.mxu1 }
 0x1df   :  { %v679_v36 = vsel %vm640_vm0, %v562_v30, %v663_v32  ;;  %v567_v37 = vadd.f32 %v840_v33, %v1142_v25 }
 0x1e0   :  { %695 = vst [vmem:[#allocation11] sm:$0xff] %v679_v36  ;;  %v842_v38 = vpop.f32.mrf.mxu0  ;;  %v848_v39 = vpop.f32.mrf.mxu1 }
 0x1e1   :  { %vm641_vm1 = vcmp.gt.f32.partialorder %v567_v37, 0.0  ;;  %v664_v40 = vmul.f32 %v1147_v28, %v567_v37  ;;  %v843_v41 = vadd.f32 %v842_v38, %v841_v34  ;;  %v849_v42 = vadd.f32 %v848_v39, %v847_v35 }
 0x1e2   :  { %v844_v43 = vpop.f32.mrf.mxu0  ;;  %v850_v44 = vpop.f32.mrf.mxu1 }
 0x1e3   :  { %v680_v45 = vsel %vm641_vm1, %v567_v37, %v664_v40  ;;  %v572_v46 = vadd.f32 %v843_v41, %v1142_v25  ;;  %v582_v47 = vadd.f32 %v849_v42, %v1142_v25 }
 0x1e4   :  { %696 = vst [vmem:[#allocation11 + $0x8] sm:$0xff] %v680_v45  ;;  %v845_v48 = vpop.f32.mrf.mxu0  ;;  %v851_v49 = vpop.f32.mrf.mxu1 }
 0x1e5   :  { %vm642_vm2 = vcmp.gt.f32.partialorder %v572_v46, 0.0  ;;  %v665_v50 = vmul.f32 %v1147_v28, %v572_v46  ;;  %vm644_vm3 = vcmp.gt.f32.partialorder %v582_v47, 0.0  ;;  %v667_v51 = vmul.f32 %v1147_v28, %v582_v47 }
 0x1e6   :  { %v846_v52 = vadd.f32 %v845_v48, %v844_v43  ;;  %v852_v53 = vadd.f32 %v851_v49, %v850_v44  ;;  %v853_v54 = vpop.f32.mrf.mxu1 }
 0x1e7   :  { %v681_v55 = vsel %vm642_vm2, %v572_v46, %v665_v50  ;;  %v683_v56 = vsel %vm644_vm3, %v582_v47, %v667_v51 }
 0x1e8   :  { %697 = vst [vmem:[#allocation11 + $0x10] sm:$0xff] %v681_v55  ;;  %699 = vst [vmem:[#allocation11 + $0x20] sm:$0xff] %v683_v56  ;;  %v577_v57 = vadd.f32 %v846_v52, %v1142_v25  ;;  %v587_v58 = vadd.f32 %v852_v53, %v1142_v25  ;;  %v854_v59 = vpop.f32.mrf.mxu1 }
 0x1e9   :  { %v855_v60 = vadd.f32 %v854_v59, %v853_v54 }
 0x1ea   :  { %vm643_vm4 = vcmp.gt.f32.partialorder %v577_v57, 0.0  ;;  %v666_v61 = vmul.f32 %v1147_v28, %v577_v57  ;;  %vm645_vm5 = vcmp.gt.f32.partialorder %v587_v58, 0.0  ;;  %v668_v62 = vmul.f32 %v1147_v28, %v587_v58  ;;  %v856_v63 = vpop.f32.mrf.mxu1 }
 0x1eb   :  { %v592_v0 = vadd.f32 %v855_v60, %v1142_v25 }
 0x1ec   :  { %v682_v1 = vsel %vm643_vm4, %v577_v57, %v666_v61  ;;  %v684_v2 = vsel %vm645_vm5, %v587_v58, %v668_v62  ;;  %v857_v3 = vpop.f32.mrf.mxu1 }
 0x1ed   :  { %698 = vst [vmem:[#allocation11 + $0x18] sm:$0xff] %v682_v1  ;;  %700 = vst [vmem:[#allocation11 + $0x28] sm:$0xff] %v684_v2  ;;  %vm646_vm6 = vcmp.gt.f32.partialorder %v592_v0, 0.0  ;;  %v669_v4 = vmul.f32 %v1147_v28, %v592_v0  ;;  %v858_v5 = vadd.f32 %v857_v3, %v856_v63 }
 0x1ee   :  { %v859_v6 = vpop.f32.mrf.mxu1 }
 0x1ef   :  { %v685_v7 = vsel %vm646_vm6, %v592_v0, %v669_v4  ;;  %v597_v8 = vadd.f32 %v858_v5, %v1142_v25 }
 0x1f0   :  { %701 = vst [vmem:[#allocation11 + $0x30] sm:$0xff] %v685_v7  ;;  %v860_v9 = vpop.f32.mrf.mxu1 }
 0x1f1   :  { %vm647_vm7 = vcmp.gt.f32.partialorder %v597_v8, 0.0  ;;  %v670_v10 = vmul.f32 %v1147_v28, %v597_v8  ;;  %v861_v11 = vadd.f32 %v860_v9, %v859_v6 }
 0x1f2   :  { %v862_v12 = vpop.f32.mrf.mxu1 }
 0x1f3   :  { %v686_v13 = vsel %vm647_vm7, %v597_v8, %v670_v10  ;;  %v602_v14 = vadd.f32 %v861_v11, %v1142_v25 }
 0x1f4   :  { %702 = vst [vmem:[#allocation11 + $0x38] sm:$0xff] %v686_v13  ;;  %v863_v15 = vpop.f32.mrf.mxu1 }
 0x1f5   :  { %vm648_vm8 = vcmp.gt.f32.partialorder %v602_v14, 0.0  ;;  %v671_v16 = vmul.f32 %v1147_v28, %v602_v14  ;;  %v864_v17 = vadd.f32 %v863_v15, %v862_v12 }
 0x1f6   :  { %v865_v18 = vpop.f32.mrf.mxu1 }
 0x1f7   :  { %v687_v19 = vsel %vm648_vm8, %v602_v14, %v671_v16  ;;  %v607_v20 = vadd.f32 %v864_v17, %v1142_v25 }
 0x1f8   :  { %703 = vst [vmem:[#allocation11 + $0x40] sm:$0xff] %v687_v19  ;;  %v866_v21 = vpop.f32.mrf.mxu1 }
 0x1f9   :  { %vm649_vm9 = vcmp.gt.f32.partialorder %v607_v20, 0.0  ;;  %v672_v22 = vmul.f32 %v1147_v28, %v607_v20  ;;  %v867_v23 = vadd.f32 %v866_v21, %v865_v18 }
 0x1fa   :  { %v868_v24 = vpop.f32.mrf.mxu1 }
 0x1fb   :  { %v688_v26 = vsel %vm649_vm9, %v607_v20, %v672_v22  ;;  %v612_v27 = vadd.f32 %v867_v23, %v1142_v25 }
 0x1fc   :  { %704 = vst [vmem:[#allocation11 + $0x48] sm:$0xff] %v688_v26  ;;  %v869_v29 = vpop.f32.mrf.mxu1 }
 0x1fd   :  { %vm650_vm10 = vcmp.gt.f32.partialorder %v612_v27, 0.0  ;;  %v673_v30 = vmul.f32 %v1147_v28, %v612_v27  ;;  %v870_v31 = vadd.f32 %v869_v29, %v868_v24 }
 0x1fe   :  { %v871_v32 = vpop.f32.mrf.mxu1 }
 0x1ff   :  { %v689_v33 = vsel %vm650_vm10, %v612_v27, %v673_v30  ;;  %v617_v34 = vadd.f32 %v870_v31, %v1142_v25 }
 0x200   :  { %705 = vst [vmem:[#allocation11 + $0x50] sm:$0xff] %v689_v33  ;;  %v872_v35 = vpop.f32.mrf.mxu1 }
 0x201   :  { %vm651_vm11 = vcmp.gt.f32.partialorder %v617_v34, 0.0  ;;  %v674_v36 = vmul.f32 %v1147_v28, %v617_v34  ;;  %v873_v37 = vadd.f32 %v872_v35, %v871_v32 }
 0x202   :  { %v874_v38 = vpop.f32.mrf.mxu1 }
 0x203   :  { %v690_v39 = vsel %vm651_vm11, %v617_v34, %v674_v36  ;;  %v622_v40 = vadd.f32 %v873_v37, %v1142_v25 }
 0x204   :  { %706 = vst [vmem:[#allocation11 + $0x58] sm:$0xff] %v690_v39  ;;  %v875_v41 = vpop.f32.mrf.mxu1 }
 0x205   :  { %vm652_vm12 = vcmp.gt.f32.partialorder %v622_v40, 0.0  ;;  %v675_v42 = vmul.f32 %v1147_v28, %v622_v40  ;;  %v876_v43 = vadd.f32 %v875_v41, %v874_v38 }
 0x206   :  { %v877_v44 = vpop.f32.mrf.mxu1 }
 0x207   :  { %v691_v45 = vsel %vm652_vm12, %v622_v40, %v675_v42  ;;  %v627_v46 = vadd.f32 %v876_v43, %v1142_v25 }
 0x208   :  { %707 = vst [vmem:[#allocation11 + $0x60] sm:$0xff] %v691_v45  ;;  %v878_v47 = vpop.f32.mrf.mxu1 }
 0x209   :  { %vm653_vm13 = vcmp.gt.f32.partialorder %v627_v46, 0.0  ;;  %v676_v48 = vmul.f32 %v1147_v28, %v627_v46  ;;  %v879_v49 = vadd.f32 %v878_v47, %v877_v44 }
 0x20a   :  { %v880_v50 = vpop.f32.mrf.mxu1 }
 0x20b   :  { %v692_v51 = vsel %vm653_vm13, %v627_v46, %v676_v48  ;;  %v632_v52 = vadd.f32 %v879_v49, %v1142_v25 }
 0x20c   :  { %708 = vst [vmem:[#allocation11 + $0x68] sm:$0xff] %v692_v51  ;;  %v881_v53 = vpop.f32.mrf.mxu1 }
 0x20d   :  { %vm654_vm14 = vcmp.gt.f32.partialorder %v632_v52, 0.0  ;;  %v677_v54 = vmul.f32 %v1147_v28, %v632_v52  ;;  %v882_v55 = vadd.f32 %v881_v53, %v880_v50 }
 0x20f   :  { %v693_v56 = vsel %vm654_vm14, %v632_v52, %v677_v54  ;;  %v637_v57 = vadd.f32 %v882_v55, %v1142_v25 }
 0x210   :  { %709 = vst [vmem:[#allocation11 + $0x70] sm:$0xff] %v693_v56 }
 0x211   :  { %vm655_vm15 = vcmp.gt.f32.partialorder %v637_v57, 0.0  ;;  %v678_v58 = vmul.f32 %v1147_v28, %v637_v57 }
 0x213   :  { %v694_v59 = vsel %vm655_vm15, %v637_v57, %v678_v58 }
 0x214   :  { %710 = vst [vmem:[#allocation11 + $0x78] sm:$0xff] %v694_v59 }
 0x215   :  { %1063 = shalt.err (!%p1060_p10)
}
 0x216   :  { %722 = dma.vmem_to_hbm [thread:$0]  %s717_s5, 2048, %s1193_s6, [#allocation5], %s1086_s0, %s1086_s0, %s1087_s16  }
 0x217   :  { %1078 = dma.done.wait [#allocation5], 2048  }
 0x218   :  { %1079 = vsyncadd [#allocation5], 4294965248 }
 0x219   :  { %726 = vsyncpa [#allocation4], 1 }
 0x21a   :  { %727 = vsyncpa [#allocation7], 1 }
 0x21b   :  { %728 = vsyncpa [#allocation10], 1 }
 0x21c   :  { %729 = vsyncpa [#allocation5], 1 }

</bundles_post_ra>
